<compile_context>
chip_gen: v7x
topology: tpu7x:2x2x1
jax: 0.10.0
libtpu: 0.0.40
codegen_flags: <defaults>
</compile_context>

<pallas_src>
import jax
import jax.numpy as jnp
from jax.experimental import pallas as pl
from jax.experimental.pallas import tpu as pltpu


# Row layout of the packed vector-parameter tile (one (8, 128) f32 VMEM tile).
_ROW_G0, _ROW_BE0, _ROW_G1, _ROW_BE1, _ROW_G2, _ROW_BE2, _ROW_W3, _ROW_B3 = range(8)
_PACK_LANES = 128


def _batchnorm(x, gamma, beta, eps=1e-5):
    """Training-mode BatchNorm1d: batch stats, biased variance, eps=1e-5."""
    mu = jnp.mean(x, axis=0, keepdims=True)
    xm = x - mu                                    # bind once; reused twice below
    var = jnp.mean(xm * xm, axis=0, keepdims=True)
    scale = jax.lax.rsqrt(var + eps) * gamma       # fold gamma into the scale
    return xm * scale + beta


def _leaky_relu(x, slope=0.01):
    return jnp.where(x > 0, x, slope * x)


def critic_kernel(state_ref, action_ref, w1_ref, w2s_ref, w2a_ref, vec_ref, out_ref):
    S = state_ref.shape[1]    # state_size
    A = action_ref.shape[1]   # action_size
    F1 = w1_ref.shape[1]      # fc1_units
    F2 = w2s_ref.shape[1]     # fc2_units

    # --- bn0 on raw state ----------------------------------------------------
    g0 = vec_ref[_ROW_G0:_ROW_G0 + 1, :S]
    be0 = vec_ref[_ROW_BE0:_ROW_BE0 + 1, :S]
    s = _batchnorm(state_ref[...], g0, be0)

    # --- fc1 (bias dropped: exactly cancelled by bn1) -> bn1 -> leaky_relu ----
    xs = jnp.dot(s, w1_ref[...], preferred_element_type=jnp.float32)
    g1 = vec_ref[_ROW_G1:_ROW_G1 + 1, :F1]
    be1 = vec_ref[_ROW_BE1:_ROW_BE1 + 1, :F1]
    xs = _leaky_relu(_batchnorm(xs, g1, be1))

    # --- cat(xs, action) @ W2 == xs @ W2_xs + action @ W2_a -------------------
    # The K=A (=2) contraction runs on the VPU as A broadcast FMAs; only the
    # real (F1 x F2) matmul touches the MXU.  fc2 bias dropped (cancelled by bn2).
    x = jnp.dot(xs, w2s_ref[...], preferred_element_type=jnp.float32)
    for i in range(A):
        x = x + action_ref[:, i:i + 1] * w2a_ref[i:i + 1, :]
    g2 = vec_ref[_ROW_G2:_ROW_G2 + 1, :F2]
    be2 = vec_ref[_ROW_BE2:_ROW_BE2 + 1, :F2]
    x = _leaky_relu(_batchnorm(x, g2, be2))

    # --- fc3 (N=1): lane-wise multiply + cross-lane reduce instead of MXU -----
    w3 = vec_ref[_ROW_W3:_ROW_W3 + 1, :F2]
    b3 = vec_ref[_ROW_B3:_ROW_B3 + 1, 0:1]
    out_ref[...] = jnp.sum(x * w3, axis=-1, keepdims=True) + b3


def critic_forward(state, action, params):
    """params: dict with 'w1' [S,F1], 'w2_xs' [F1,F2], 'w2_a' [A,F2], 'vec' [8,128]."""
    B, S = state.shape
    A = action.shape[1]
    F1 = params["w1"].shape[1]
    F2 = params["w2_xs"].shape[1]

    args = (state, action, params["w1"], params["w2_xs"], params["w2_a"], params["vec"])

    flops = 2 * B * (S * F1 + F1 * F2 + A * F2 + F2) + 12 * B * (S + F1 + F2)
    bytes_accessed = 4 * (sum(int(a.size) for a in args) + B)

    return pl.pallas_call(
        critic_kernel,
        out_shape=jax.ShapeDtypeStruct((B, 1), jnp.float32),
        in_specs=[pl.BlockSpec(memory_space=pltpu.MemorySpace.VMEM)] * len(args),
        out_specs=pl.BlockSpec(memory_space=pltpu.MemorySpace.VMEM),
        cost_estimate=pl.CostEstimate(
            flops=int(flops),
            transcendentals=3 * (S + F1 + F2),   # three rsqrt vectors
            bytes_accessed=int(bytes_accessed),
        ),
    )(*args)


def _pack_vec_params(state_size, fc1_units, fc2_units, g0, be0, g1, be1, g2, be2, w3, b3):
    """Pack all per-feature vectors + fc3 weight/bias into one (8, 128) tile."""
    assert state_size <= _PACK_LANES and fc1_units <= _PACK_LANES and fc2_units <= _PACK_LANES
    vec = jnp.zeros((8, _PACK_LANES), jnp.float32)
    vec = vec.at[_ROW_G0, :state_size].set(g0)
    vec = vec.at[_ROW_BE0, :state_size].set(be0)
    vec = vec.at[_ROW_G1, :fc1_units].set(g1)
    vec = vec.at[_ROW_BE1, :fc1_units].set(be1)
    vec = vec.at[_ROW_G2, :fc2_units].set(g2)
    vec = vec.at[_ROW_BE2, :fc2_units].set(be2)
    vec = vec.at[_ROW_W3, :fc2_units].set(w3)
    vec = vec.at[_ROW_B3, 0].set(b3)
    return vec


def make_params(key, state_size, action_size, fc1_units=128, fc2_units=64):
    """Deterministic synthetic parameters matching the PyTorch module's shapes.

    PyTorch Linear weight is (out, in); we store the transpose (in, out).
    hidden_init's bounds are mimicked (lim = 1/sqrt(out_features), matching the
    module's fan_in = weight.size()[0] quirk); fc3 uses +/-3e-3.
    fc1/fc2 biases are not materialized: they are exactly cancelled by the
    BatchNorm layers that follow them.
    """
    ks = jax.random.split(key, 4)
    lim1 = 1.0 / jnp.sqrt(float(fc1_units))
    lim2 = 1.0 / jnp.sqrt(float(fc2_units))

    w1 = jax.random.uniform(ks[0], (state_size, fc1_units), jnp.float32, -lim1, lim1)
    w2 = jax.random.uniform(
        ks[1], (fc1_units + action_size, fc2_units), jnp.float32, -lim2, lim2
    )
    w3 = jax.random.uniform(ks[2], (fc2_units,), jnp.float32, -3e-3, 3e-3)
    b3 = jax.random.uniform(ks[3], (), jnp.float32, -3e-3, 3e-3)

    # Fresh BatchNorm1d affine params: gamma=1, beta=0.
    vec = _pack_vec_params(
        state_size, fc1_units, fc2_units,
        jnp.ones((state_size,), jnp.float32), jnp.zeros((state_size,), jnp.float32),
        jnp.ones((fc1_units,), jnp.float32), jnp.zeros((fc1_units,), jnp.float32),
        jnp.ones((fc2_units,), jnp.float32), jnp.zeros((fc2_units,), jnp.float32),
        w3, b3,
    )
    return {"w1": w1, "w2_xs": w2[:fc1_units], "w2_a": w2[fc1_units:], "vec": vec}


def _reference_forward(state, action, params, fc1_units=128, fc2_units=64):
    """Pure-JAX reference with identical math (for a sanity check)."""
    vec = params["vec"]
    S = state.shape[1]

    def bn(x, g, b):
        mu = jnp.mean(x, axis=0, keepdims=True)
        var = jnp.mean((x - mu) ** 2, axis=0, keepdims=True)
        return (x - mu) * jax.lax.rsqrt(var + 1e-5) * g + b

    lrelu = lambda v: jnp.where(v > 0, v, 0.01 * v)
    s = bn(state, vec[_ROW_G0, :S], vec[_ROW_BE0, :S])
    xs = lrelu(bn(s @ params["w1"], vec[_ROW_G1, :fc1_units], vec[_ROW_BE1, :fc1_units]))
    x = xs @ params["w2_xs"] + action @ params["w2_a"]
    x = lrelu(bn(x, vec[_ROW_G2, :fc2_units], vec[_ROW_BE2, :fc2_units]))
    return x @ vec[_ROW_W3, :fc2_units][:, None] + vec[_ROW_B3, 0]


if __name__ == "__main__":
    B, STATE, ACTION = 8, 24, 2   # Tennis-like sizes; fc1=128, fc2=64 (module defaults)
    FC1, FC2 = 128, 64
    key = jax.random.PRNGKey(0)
    k_s, k_a, k_p = jax.random.split(key, 3)

    state = jax.random.normal(k_s, (B, STATE), jnp.float32)
    action = jax.random.uniform(k_a, (B, ACTION), jnp.float32, -1.0, 1.0)
    params = make_params(k_p, STATE, ACTION, FC1, FC2)

    q = critic_forward(state, action, params)
    jax.block_until_ready(q)
    assert q.shape == (B, 1) and q.dtype == jnp.float32

    q_ref = _reference_forward(state, action, params, FC1, FC2)
    assert jnp.allclose(q, q_ref, rtol=1e-3, atol=1e-4), (q, q_ref)

    # TODO(synk): amortize dispatch further at the call site by stacking the
    # local + target critics (or multiple batches) into one pallas_call.
    print("KERNEL_OK")
</pallas_src>

<mosaic_0001>
module attributes {stable_mosaic.version = 11 : i64} {
  func.func @critic_kernel(%arg0: memref<8x24xf32, #tpu.memory_space<vmem>>, %arg1: memref<8x2xf32, #tpu.memory_space<vmem>>, %arg2: memref<24x128xf32, #tpu.memory_space<vmem>>, %arg3: memref<128x64xf32, #tpu.memory_space<vmem>>, %arg4: memref<2x64xf32, #tpu.memory_space<vmem>>, %arg5: memref<8x128xf32, #tpu.memory_space<vmem>>, %arg6: memref<8x1xf32, #tpu.memory_space<vmem>>) attributes {dimension_semantics = [], scalar_prefetch = 0 : i64, scratch_operands = 0 : i64, tpu.core_type = #tpu.core_type<tc>} {
    %c0 = arith.constant 0 : index
    %c0_0 = arith.constant 0 : index
    %0 = vector.load %arg5[%c0, %c0_0] : memref<8x128xf32, #tpu.memory_space<vmem>>, vector<1x24xf32>
    %c1 = arith.constant 1 : index
    %c0_1 = arith.constant 0 : index
    %1 = vector.load %arg5[%c1, %c0_1] : memref<8x128xf32, #tpu.memory_space<vmem>>, vector<1x24xf32>
    %c0_2 = arith.constant 0 : index
    %c0_3 = arith.constant 0 : index
    %2 = vector.load %arg0[%c0_2, %c0_3] : memref<8x24xf32, #tpu.memory_space<vmem>>, vector<8x24xf32>
    %cst = arith.constant dense<0.000000e+00> : vector<24xf32>
    %3 = vector.multi_reduction <add>, %2, %cst [0] : vector<8x24xf32> to vector<24xf32>
    %4 = vector.shape_cast %3 : vector<24xf32> to vector<1x24xf32>
    %cst_4 = arith.constant 8.000000e+00 : f32
    %5 = vector.broadcast %cst_4 : f32 to vector<1x24xf32>
    %6 = arith.divf %4, %5 : vector<1x24xf32>
    %7 = vector.broadcast %6 : vector<1x24xf32> to vector<8x24xf32>
    %8 = arith.subf %2, %7 : vector<8x24xf32>
    %9 = arith.mulf %8, %8 : vector<8x24xf32>
    %cst_5 = arith.constant dense<0.000000e+00> : vector<24xf32>
    %10 = vector.multi_reduction <add>, %9, %cst_5 [0] : vector<8x24xf32> to vector<24xf32>
    %11 = vector.shape_cast %10 : vector<24xf32> to vector<1x24xf32>
    %cst_6 = arith.constant 8.000000e+00 : f32
    %12 = vector.broadcast %cst_6 : f32 to vector<1x24xf32>
    %13 = arith.divf %11, %12 : vector<1x24xf32>
    %cst_7 = arith.constant 9.99999974E-6 : f32
    %14 = vector.broadcast %cst_7 : f32 to vector<1x24xf32>
    %15 = arith.addf %13, %14 : vector<1x24xf32>
    %16 = math.rsqrt %15 : vector<1x24xf32>
    %17 = arith.mulf %16, %0 : vector<1x24xf32>
    %18 = vector.broadcast %17 : vector<1x24xf32> to vector<8x24xf32>
    %19 = arith.mulf %8, %18 : vector<8x24xf32>
    %20 = vector.broadcast %1 : vector<1x24xf32> to vector<8x24xf32>
    %21 = arith.addf %19, %20 : vector<8x24xf32>
    %c0_8 = arith.constant 0 : index
    %c0_9 = arith.constant 0 : index
    %22 = vector.load %arg2[%c0_8, %c0_9] : memref<24x128xf32, #tpu.memory_space<vmem>>, vector<24x128xf32>
    %cst_10 = arith.constant dense<0.000000e+00> : vector<8x128xf32>
    %23 = tpu.matmul %21, %22, %cst_10 {dimension_numbers = #tpu.dot_dimension_numbers<[1], [0], [0], [1], [0, 0, 1, 1], [], []>} : vector<8x24xf32>, vector<24x128xf32>, vector<8x128xf32> -> vector<8x128xf32>
    %c2 = arith.constant 2 : index
    %c0_11 = arith.constant 0 : index
    %24 = vector.load %arg5[%c2, %c0_11] : memref<8x128xf32, #tpu.memory_space<vmem>>, vector<1x128xf32>
    %c3 = arith.constant 3 : index
    %c0_12 = arith.constant 0 : index
    %25 = vector.load %arg5[%c3, %c0_12] : memref<8x128xf32, #tpu.memory_space<vmem>>, vector<1x128xf32>
    %cst_13 = arith.constant dense<0.000000e+00> : vector<128xf32>
    %26 = vector.multi_reduction <add>, %23, %cst_13 [0] : vector<8x128xf32> to vector<128xf32>
    %27 = vector.shape_cast %26 : vector<128xf32> to vector<1x128xf32>
    %cst_14 = arith.constant 8.000000e+00 : f32
    %28 = vector.broadcast %cst_14 : f32 to vector<1x128xf32>
    %29 = arith.divf %27, %28 : vector<1x128xf32>
    %30 = vector.broadcast %29 : vector<1x128xf32> to vector<8x128xf32>
    %31 = arith.subf %23, %30 : vector<8x128xf32>
    %32 = arith.mulf %31, %31 : vector<8x128xf32>
    %cst_15 = arith.constant dense<0.000000e+00> : vector<128xf32>
    %33 = vector.multi_reduction <add>, %32, %cst_15 [0] : vector<8x128xf32> to vector<128xf32>
    %34 = vector.shape_cast %33 : vector<128xf32> to vector<1x128xf32>
    %cst_16 = arith.constant 8.000000e+00 : f32
    %35 = vector.broadcast %cst_16 : f32 to vector<1x128xf32>
    %36 = arith.divf %34, %35 : vector<1x128xf32>
    %cst_17 = arith.constant 9.99999974E-6 : f32
    %37 = vector.broadcast %cst_17 : f32 to vector<1x128xf32>
    %38 = arith.addf %36, %37 : vector<1x128xf32>
    %39 = math.rsqrt %38 : vector<1x128xf32>
    %40 = arith.mulf %39, %24 : vector<1x128xf32>
    %41 = vector.broadcast %40 : vector<1x128xf32> to vector<8x128xf32>
    %42 = arith.mulf %31, %41 : vector<8x128xf32>
    %43 = vector.broadcast %25 : vector<1x128xf32> to vector<8x128xf32>
    %44 = arith.addf %42, %43 : vector<8x128xf32>
    %cst_18 = arith.constant 0.000000e+00 : f32
    %45 = vector.broadcast %cst_18 : f32 to vector<8x128xf32>
    %46 = arith.cmpf ogt, %44, %45 : vector<8x128xf32>
    %cst_19 = arith.constant 0.00999999977 : f32
    %47 = vector.broadcast %cst_19 : f32 to vector<8x128xf32>
    %48 = arith.mulf %47, %44 : vector<8x128xf32>
    %49 = arith.select %46, %44, %48 : vector<8x128xi1>, vector<8x128xf32>
    %c0_20 = arith.constant 0 : index
    %c0_21 = arith.constant 0 : index
    %50 = vector.load %arg3[%c0_20, %c0_21] : memref<128x64xf32, #tpu.memory_space<vmem>>, vector<128x64xf32>
    %cst_22 = arith.constant dense<0.000000e+00> : vector<8x64xf32>
    %51 = tpu.matmul %49, %50, %cst_22 {dimension_numbers = #tpu.dot_dimension_numbers<[1], [0], [0], [1], [0, 0, 1, 1], [], []>} : vector<8x128xf32>, vector<128x64xf32>, vector<8x64xf32> -> vector<8x64xf32>
    %c0_23 = arith.constant 0 : index
    %c0_24 = arith.constant 0 : index
    %52 = vector.load %arg1[%c0_23, %c0_24] : memref<8x2xf32, #tpu.memory_space<vmem>>, vector<8x1xf32>
    %c0_25 = arith.constant 0 : index
    %c0_26 = arith.constant 0 : index
    %53 = vector.load %arg4[%c0_25, %c0_26] : memref<2x64xf32, #tpu.memory_space<vmem>>, vector<1x64xf32>
    %54 = vector.broadcast %52 : vector<8x1xf32> to vector<8x64xf32>
    %55 = vector.broadcast %53 : vector<1x64xf32> to vector<8x64xf32>
    %56 = arith.mulf %54, %55 : vector<8x64xf32>
    %57 = arith.addf %51, %56 : vector<8x64xf32>
    %c0_27 = arith.constant 0 : index
    %c1_28 = arith.constant 1 : index
    %58 = vector.load %arg1[%c0_27, %c1_28] : memref<8x2xf32, #tpu.memory_space<vmem>>, vector<8x1xf32>
    %c1_29 = arith.constant 1 : index
    %c0_30 = arith.constant 0 : index
    %59 = vector.load %arg4[%c1_29, %c0_30] : memref<2x64xf32, #tpu.memory_space<vmem>>, vector<1x64xf32>
    %60 = vector.broadcast %58 : vector<8x1xf32> to vector<8x64xf32>
    %61 = vector.broadcast %59 : vector<1x64xf32> to vector<8x64xf32>
    %62 = arith.mulf %60, %61 : vector<8x64xf32>
    %63 = arith.addf %57, %62 : vector<8x64xf32>
    %c4 = arith.constant 4 : index
    %c0_31 = arith.constant 0 : index
    %64 = vector.load %arg5[%c4, %c0_31] : memref<8x128xf32, #tpu.memory_space<vmem>>, vector<1x64xf32>
    %c5 = arith.constant 5 : index
    %c0_32 = arith.constant 0 : index
    %65 = vector.load %arg5[%c5, %c0_32] : memref<8x128xf32, #tpu.memory_space<vmem>>, vector<1x64xf32>
    %cst_33 = arith.constant dense<0.000000e+00> : vector<64xf32>
    %66 = vector.multi_reduction <add>, %63, %cst_33 [0] : vector<8x64xf32> to vector<64xf32>
    %67 = vector.shape_cast %66 : vector<64xf32> to vector<1x64xf32>
    %cst_34 = arith.constant 8.000000e+00 : f32
    %68 = vector.broadcast %cst_34 : f32 to vector<1x64xf32>
    %69 = arith.divf %67, %68 : vector<1x64xf32>
    %70 = vector.broadcast %69 : vector<1x64xf32> to vector<8x64xf32>
    %71 = arith.subf %63, %70 : vector<8x64xf32>
    %72 = arith.mulf %71, %71 : vector<8x64xf32>
    %cst_35 = arith.constant dense<0.000000e+00> : vector<64xf32>
    %73 = vector.multi_reduction <add>, %72, %cst_35 [0] : vector<8x64xf32> to vector<64xf32>
    %74 = vector.shape_cast %73 : vector<64xf32> to vector<1x64xf32>
    %cst_36 = arith.constant 8.000000e+00 : f32
    %75 = vector.broadcast %cst_36 : f32 to vector<1x64xf32>
    %76 = arith.divf %74, %75 : vector<1x64xf32>
    %cst_37 = arith.constant 9.99999974E-6 : f32
    %77 = vector.broadcast %cst_37 : f32 to vector<1x64xf32>
    %78 = arith.addf %76, %77 : vector<1x64xf32>
    %79 = math.rsqrt %78 : vector<1x64xf32>
    %80 = arith.mulf %79, %64 : vector<1x64xf32>
    %81 = vector.broadcast %80 : vector<1x64xf32> to vector<8x64xf32>
    %82 = arith.mulf %71, %81 : vector<8x64xf32>
    %83 = vector.broadcast %65 : vector<1x64xf32> to vector<8x64xf32>
    %84 = arith.addf %82, %83 : vector<8x64xf32>
    %cst_38 = arith.constant 0.000000e+00 : f32
    %85 = vector.broadcast %cst_38 : f32 to vector<8x64xf32>
    %86 = arith.cmpf ogt, %84, %85 : vector<8x64xf32>
    %cst_39 = arith.constant 0.00999999977 : f32
    %87 = vector.broadcast %cst_39 : f32 to vector<8x64xf32>
    %88 = arith.mulf %87, %84 : vector<8x64xf32>
    %89 = arith.select %86, %84, %88 : vector<8x64xi1>, vector<8x64xf32>
    %c6 = arith.constant 6 : index
    %c0_40 = arith.constant 0 : index
    %90 = vector.load %arg5[%c6, %c0_40] : memref<8x128xf32, #tpu.memory_space<vmem>>, vector<1x64xf32>
    %c7 = arith.constant 7 : index
    %c0_41 = arith.constant 0 : index
    %91 = vector.load %arg5[%c7, %c0_41] : memref<8x128xf32, #tpu.memory_space<vmem>>, vector<1x1xf32>
    %92 = vector.broadcast %90 : vector<1x64xf32> to vector<8x64xf32>
    %93 = arith.mulf %89, %92 : vector<8x64xf32>
    %cst_42 = arith.constant dense<0.000000e+00> : vector<8xf32>
    %94 = vector.multi_reduction <add>, %93, %cst_42 [1] : vector<8x64xf32> to vector<8xf32>
    %95 = vector.shape_cast %94 : vector<8xf32> to vector<8x1xf32>
    %96 = vector.broadcast %91 : vector<1x1xf32> to vector<8x1xf32>
    %97 = arith.addf %95, %96 : vector<8x1xf32>
    %c0_43 = arith.constant 0 : index
    %c0_44 = arith.constant 0 : index
    %98 = vector.load %arg6[%c0_43, %c0_44] : memref<8x1xf32, #tpu.memory_space<vmem>>, vector<8x1xf32>
    tpu.vector_store %arg6[%c0_43, %c0_44], %97 {strides = array<i32>} : memref<8x1xf32, #tpu.memory_space<vmem>>, vector<8x1xf32>,
    return
  }
}

</mosaic_0001>

<bundles_post_ra>
// kernel: tpu_custom_call.1
= control target key start
LH: loop header
LB: loop body
LE: loop exit
PB: predicated region body
PF: predicated region fallthrough
CT: control target
= control target key end

     0   :  { %vm26_vm0 = vcmask 195584   ;;  %v449_v0 = vmov 0.0|0.0   ;;  %vm450_vm1 = vmmov 0   ;;  %v451_v3 = vmov 0.0   ;;  %s605_s2 = inlined_call_operand.vmem [shape: f32[24,128], index: 2, kind: input, shape index: {}]   ;;  %s606_s0 = inlined_call_operand.vmem [shape: f32[8,24], index: 0, kind: input, shape index: {}]   ;;  %s607_s5 = inlined_call_operand.vmem [shape: f32[8,128], index: 5, kind: input, shape index: {}]   ;;  %s608_s3 = inlined_call_operand.vmem [shape: f32[128,64], index: 3, kind: input, shape index: {}]   ;;  %s609_s1 = inlined_call_operand.vmem [shape: f32[8,2], index: 1, kind: input, shape index: {}]   ;;  %s610_s4 = inlined_call_operand.vmem [shape: f32[2,64], index: 4, kind: input, shape index: {}]   ;;  %s611_s6 = inlined_call_operand.vmem [shape: f32[8,1], index: 6, kind: output, shape index: {}]  }
   0x1   :  { %409 = vmatprep.subr.bf16.mxu0 %v449_v0  ;;  %v59_v1 = vld [vmem:[%s605_s2] sm:$0xff]  ;;  %v60_v2 = vld [vmem:[%s605_s2 + $0x8] sm:$0xff]  ;;  %371 = vmatprep.mubr.msk.f32.mxu0 %vm450_vm1, %v451_v3  ;;  %v61_v8 = vld [vmem:[%s605_s2 + $0x10] sm:$0xff]  ;;  %v49_v26 = vlaneseq  ;;  %v452_v60 = vmov 0   ;;  %v453_v62 = vmov 1   ;;  %vm280_vm3 = vcmask 523264  }
   0x2   :  { %v410_v4 = vpack.c.bf16 %v60_v2, %v59_v1  ;;  %v25_v5 = vld [vmem:[%s606_s0] sm:$0xff]  ;;  %412 = vmatprep.subr.bf16.mxu1 %v449_v0  ;;  %406 = vmatprep.mubr.msk.f32.mxu1 %vm450_vm1, %v451_v3  ;;  %v170_v37 = vld [vmem:[%s608_s3 + $0x8] sm:$0xff]  ;;  %v171_v39 = vld [vmem:[%s608_s3 + $0x10] sm:$0xff]  ;;  %vm330_vm5 = vcmask 7168  }
   0x3   :  { %v27_v6 = vsel %vm26_vm0, %v25_v5, 0.0  ;;  %v50_v27 = vshrl.u32 %v49_v26, 7  ;;  %v23_v28 = vld [vmem:[%s607_s5] sm:$0x1]  ;;  %v336_v33 = vld [vmem:[%s607_s5 + $0x1] ss:$0 sm:$0xff]  ;;  %441 = vset.pattern.permute.xlu0 %v452_v60 }
   0x4   :  { %411 = vmatpush3.bf16.msra.mxu0 %v410_v4  ;;  %v28_v7 = vrot.slane %v27_v6, 4  ;;  %v169_v36 = vld [vmem:[%s608_s3] sm:$0xff]  ;;  %v172_v40 = vld [vmem:[%s608_s3 + $0x18] sm:$0xff]  ;;  %v174_v43 = vld [vmem:[%s608_s3 + $0x28] sm:$0xff] }
   0x5   :  { %369 = vmatprep.subr.mxu0 %v451_v3  ;;  %v508_v29 = vsub.s32 0, %v50_v27  ;;  %v413_v38 = vpack.c.bf16 %v170_v37, %v169_v36  ;;  %v416_v41 = vpack.c.bf16 %v172_v40, %v171_v39  ;;  %v173_v42 = vld [vmem:[%s608_s3 + $0x20] sm:$0xff]  ;;  %v175_v45 = vld [vmem:[%s608_s3 + $0x30] sm:$0xff]  ;;  %v176_v46 = vld [vmem:[%s608_s3 + $0x38] sm:$0xff] }
   0x6   :  { %v29_v9 = vadd.f32 %v28_v7, %v27_v6  ;;  %v419_v44 = vpack.c.bf16 %v174_v43, %v173_v42  ;;  %v422_v47 = vpack.c.bf16 %v176_v46, %v175_v45  ;;  %v177_v48 = vld [vmem:[%s608_s3 + $0x40] sm:$0xff]  ;;  %v178_v49 = vld [vmem:[%s608_s3 + $0x48] sm:$0xff]  ;;  %v179_v51 = vld [vmem:[%s608_s3 + $0x50] sm:$0xff] }
   0x7   :  { %414 = vmatpush3.bf16.msra.mxu1 %v413_v38  ;;  %v425_v50 = vpack.c.bf16 %v178_v49, %v177_v48  ;;  %v180_v52 = vld [vmem:[%s608_s3 + $0x58] sm:$0xff]  ;;  %v181_v54 = vld [vmem:[%s608_s3 + $0x60] sm:$0xff]  ;;  %v182_v55 = vld [vmem:[%s608_s3 + $0x68] sm:$0xff] }
   0x8   :  { %370 = vmatpush3.msra.mxu0 %v61_v8  ;;  %v30_v10 = vrot.slane %v29_v9, 2  ;;  %415 = vmatprep.subr.bf16.mxu1 %v449_v0  ;;  %v428_v53 = vpack.c.bf16 %v180_v52, %v179_v51  ;;  %v431_v56 = vpack.c.bf16 %v182_v55, %v181_v54  ;;  %v183_v57 = vld [vmem:[%s608_s3 + $0x70] sm:$0xff]  ;;  %v184_v58 = vld [vmem:[%s608_s3 + $0x78] sm:$0xff]  ;;  %v185_v61 = vld [vmem:[%s609_s1] sm:$0xff] }
   0x9   :  { %v434_v59 = vpack.c.bf16 %v184_v58, %v183_v57  ;;  %189 = vperm.xlu0 %441, %v185_v61   ;;  %v278_v57 = vld [vmem:[%s607_s5 + $0x4] sm:$0x1] }
   0xa   :  { %v31_v11 = vadd.f32 %v30_v10, %v29_v9 }
   0xb   :  { %417 = vmatpush3.bf16.msra.mxu1 %v416_v41 }
   0xc   :  { %v32_v12 = vrot.slane %v31_v11, 1  ;;  %418 = vmatprep.subr.bf16.mxu1 %v449_v0 }
   0xd   :  { %442 = vset.pattern.permute.xlu0 %v453_v62 }
   0xe   :  { %v33_v13 = vadd.f32 %v32_v12, %v31_v11  ;;  %269 = vperm.xlu0 %442, %v185_v61   ;;  %v341_v61 = vld [vmem:[%s607_s5 + $0x5] ss:$0 sm:$0xff] }
   0xf   :  { %420 = vmatpush3.bf16.msra.mxu1 %v419_v44 }
  0x10   :  { %v35_v14 = vmul.f32 0.125, %v33_v13  ;;  %421 = vmatprep.subr.bf16.mxu1 %v449_v0 }
  0x12   :  { %v36_v15 = vsub.f32 %v25_v5, %v35_v14 }
  0x13   :  { %423 = vmatpush3.bf16.msra.mxu1 %v422_v47 }
  0x14   :  { %v37_v16 = vmul.f32 %v36_v15, %v36_v15  ;;  %424 = vmatprep.subr.bf16.mxu1 %v449_v0 }
  0x16   :  { %v38_v17 = vsel %vm26_vm0, %v37_v16, 0.0 }
  0x17   :  { %v39_v18 = vrot.slane %v38_v17, 4  ;;  %426 = vmatpush3.bf16.msra.mxu1 %v425_v50 }
  0x18   :  { %427 = vmatprep.subr.bf16.mxu1 %v449_v0 }
  0x19   :  { %v40_v19 = vadd.f32 %v39_v18, %v38_v17  ;;  %v135_v18 = vld [vmem:[%s607_s5 + $0x2] sm:$0x1] }
  0x1b   :  { %v41_v20 = vrot.slane %v40_v19, 2  ;;  %429 = vmatpush3.bf16.msra.mxu1 %v428_v53 }
  0x1c   :  { %430 = vmatprep.subr.bf16.mxu1 %v449_v0 }
  0x1d   :  { %v42_v21 = vadd.f32 %v41_v20, %v40_v19 }
  0x1f   :  { %v43_v22 = vrot.slane %v42_v21, 1  ;;  %432 = vmatpush3.bf16.msra.mxu1 %v431_v56 }
  0x20   :  { %433 = vmatprep.subr.bf16.mxu1 %v449_v0 }
  0x21   :  { %v44_v23 = vadd.f32 %v43_v22, %v42_v21  ;;  %v338_v22 = vld [vmem:[%s607_s5 + $0x3] ss:$0 sm:$0xff] }
  0x23   :  { %v45_v24 = vmul.f32 0.125, %v44_v23  ;;  %435 = vmatpush3.bf16.msra.mxu1 %v434_v59 }
  0x25   :  { %v46_v25 = vadd.f32 1e-05, %v45_v24 }
  0x27   :  { %443 = vrsqrt.f32 %v46_v25 }
  0x31   :  { %v444_v30 = vpop.eup %443 }
  0x32   :  { %v48_v31 = vmul.f32 %v444_v30, %v23_v28  ;;  %v339_v28 = vld [vmem:[%s610_s4] ss:$0 sm:$0xff]  ;;  %v340_v30 = vld [vmem:[%s610_s4 + $0x1] ss:$0 sm:$0xff] }
  0x34   :  { %v52_v32 = vrot.slane %v48_v31, %v508_v29 }
  0x36   :  { %v53_v34 = vmul.f32 %v52_v32, %v36_v15 }
  0x38   :  { %v58_v35 = vadd.f32 %v336_v33, %v53_v34 }
  0x3a   :  { %372 = vmatmul.mubr.msk.f32.vlgmr.msra.gmra.mrb[0].mxu0 %vm26_vm0, %v58_v35 }
  0x88   :  { %v190_v27 = vpop.permute.xlu0 %189 }
  0x89   :  { %v196_v32 = vmul.f32 %v339_v28, %v190_v27 }
  0x8d   :  { %v270_v31 = vpop.permute.xlu0 %269 }
  0x8e   :  { %v276_v33 = vmul.f32 %v340_v30, %v270_v31 }
 0x10d   :  { %v131_v63 = vpop.f32.mrb[0].mxu0 }
 0x10e   :  { %v137_v1 = vrot.slane %v131_v63, 4  ;;  %v373_v2 = vpop.f32.mrb[1].mxu0 }
 0x10f   :  { %v342_v2 = vld [vmem:[%s607_s5 + $0x6] ss:$0 sm:$0xff] }
 0x110   :  { %v138_v3 = vadd.f32 %v137_v1, %v131_v63 }
 0x112   :  { %v139_v4 = vrot.slane %v138_v3, 2 }
 0x114   :  { %v140_v5 = vadd.f32 %v139_v4, %v138_v3 }
 0x116   :  { %v141_v6 = vrot.slane %v140_v5, 1 }
 0x118   :  { %v142_v0 = vadd.f32 %v141_v6, %v140_v5 }
 0x11a   :  { %v143_v7 = vmul.f32 0.125, %v142_v0 }
 0x11c   :  { %v144_v8 = vsub.f32 %v131_v63, %v143_v7 }
 0x11e   :  { %v145_v9 = vmul.f32 %v144_v8, %v144_v8 }
 0x120   :  { %v146_v10 = vrot.slane %v145_v9, 4 }
 0x122   :  { %v147_v11 = vadd.f32 %v146_v10, %v145_v9 }
 0x124   :  { %v148_v12 = vrot.slane %v147_v11, 2 }
 0x126   :  { %v149_v13 = vadd.f32 %v148_v12, %v147_v11 }
 0x128   :  { %v150_v14 = vrot.slane %v149_v13, 1 }
 0x12a   :  { %v151_v15 = vadd.f32 %v150_v14, %v149_v13 }
 0x12c   :  { %v152_v16 = vmul.f32 0.125, %v151_v15 }
 0x12e   :  { %v153_v17 = vadd.f32 1e-05, %v152_v16 }
 0x130   :  { %445 = vrsqrt.f32 %v153_v17 }
 0x13a   :  { %v446_v19 = vpop.eup %445 }
 0x13b   :  { %v155_v20 = vmul.f32 %v446_v19, %v135_v18 }
 0x13d   :  { %v159_v21 = vrot.slane %v155_v20, %v508_v29 }
 0x13f   :  { %v160_v23 = vmul.f32 %v159_v21, %v144_v8 }
 0x141   :  { %v165_v24 = vadd.f32 %v338_v22, %v160_v23 }
 0x143   :  { %vm166_vm2 = vcmp.gt.f32.partialorder %v165_v24, 0.0  ;;  %v167_v25 = vmul.f32 0.01, %v165_v24 }
 0x145   :  { %v168_v26 = vsel %vm166_vm2, %v165_v24, %v167_v25 }
 0x146   :  { %407 = vmatmul.mubr.f32.vlgmr.msra.gmra.mrb[0].mxu1 %v168_v26 }
 0x219   :  { %v263_v34 = vpop.f32.mrb[0].mxu1 }
 0x21a   :  { %v264_v35 = vadd.f32 %v263_v34, %v196_v32  ;;  %v408_v36 = vpop.f32.mrb[1].mxu1 }
 0x21c   :  { %v277_v37 = vadd.f32 %v276_v33, %v264_v35 }
 0x21e   :  { %v281_v38 = vsel %vm280_vm3, %v277_v37, 0.0 }
 0x21f   :  { %v282_v39 = vrot.slane %v281_v38, 4 }
 0x221   :  { %v283_v40 = vadd.f32 %v282_v39, %v281_v38 }
 0x223   :  { %v284_v41 = vrot.slane %v283_v40, 2 }
 0x225   :  { %v285_v42 = vadd.f32 %v284_v41, %v283_v40 }
 0x227   :  { %v286_v43 = vrot.slane %v285_v42, 1 }
 0x229   :  { %v287_v44 = vadd.f32 %v286_v43, %v285_v42 }
 0x22b   :  { %v288_v45 = vmul.f32 0.125, %v287_v44 }
 0x22d   :  { %v289_v46 = vsub.f32 %v277_v37, %v288_v45 }
 0x22f   :  { %v290_v47 = vmul.f32 %v289_v46, %v289_v46 }
 0x231   :  { %v291_v48 = vsel %vm280_vm3, %v290_v47, 0.0 }
 0x232   :  { %v292_v49 = vrot.slane %v291_v48, 4 }
 0x234   :  { %v293_v50 = vadd.f32 %v292_v49, %v291_v48 }
 0x236   :  { %v294_v51 = vrot.slane %v293_v50, 2 }
 0x238   :  { %v295_v52 = vadd.f32 %v294_v51, %v293_v50 }
 0x23a   :  { %v296_v53 = vrot.slane %v295_v52, 1 }
 0x23c   :  { %v297_v54 = vadd.f32 %v296_v53, %v295_v52 }
 0x23e   :  { %v298_v55 = vmul.f32 0.125, %v297_v54 }
 0x240   :  { %v299_v56 = vadd.f32 1e-05, %v298_v55 }
 0x242   :  { %447 = vrsqrt.f32 %v299_v56 }
 0x24c   :  { %v448_v58 = vpop.eup %447 }
 0x24d   :  { %v301_v59 = vmul.f32 %v448_v58, %v278_v57 }
 0x24f   :  { %v305_v60 = vrot.slane %v301_v59, %v508_v29  ;;  %v343_v29 = vld [vmem:[%s607_s5 + $0x7] ss:$0 sm:$0xff] }
 0x251   :  { %v306_v62 = vmul.f32 %v305_v60, %v289_v46 }
 0x253   :  { %v311_v63 = vadd.f32 %v341_v61, %v306_v62 }
 0x255   :  { %vm312_vm4 = vcmp.gt.f32.partialorder %v311_v63, 0.0  ;;  %v313_v1 = vmul.f32 0.01, %v311_v63 }
 0x257   :  { %v314_v3 = vsel %vm312_vm4, %v311_v63, %v313_v1 }
 0x258   :  { %v321_v4 = vmul.f32 %v342_v2, %v314_v3 }
 0x25a   :  { %v322_v5 = vsel %vm280_vm3, %v321_v4, 0.0 }
 0x25b   :  { %323 = vadd.xlane.f32.xlu1 %v322_v5 }
 0x2e8   :  { %v324_v6 = vpop.xlane.xlu1 %323 }
 0x2e9   :  { %v329_v0 = vadd.f32 %v343_v29, %v324_v6 }
 0x2eb   :  { %331 = vst.msk [vmem:[%s611_s6] sm:$0xff] %vm330_vm5, %v329_v0 }

</bundles_post_ra>
